<compile_context>
chip_gen: v6e
topology: v6e:2x2x1
jax: 0.10.0
libtpu: 0.0.40
codegen_flags: <defaults>
</compile_context>

<pallas_src>
import functools

import jax
import jax.numpy as jnp
from jax.experimental import pallas as pl
from jax.experimental.pallas import tpu as pltpu

_SW = 128  # fixed sub-tile width (lanes) -> matmul K = r * 128


def _pixel_shuffle_kernel(x_ref, p_ref, o_ref, *, r, cl, C, tb, sw, n_sub):
    """x_ref: (tb*C, tw)   p_ref: (r*sw, sw*r) 0/1 permutation   o_ref: (tb*cl, tw*r)."""
    perm = p_ref[...]  # hoisted: constant block, loaded once per grid step
    for j in range(n_sub):                      # static offsets -> aligned slices
        cols = pl.ds(j * sw, sw)
        groups = []
        for b in range(tb):                     # fold TB batches into matmul M
            base = b * C
            # Regroup the r channel groups along lanes (contiguous, aligned
            # row slices + lane concat only):
            #   xg[b*cl + c, k*sw + w] = x[b*C + k*cl + c, j*sw + w]
            groups.append(jnp.concatenate(
                [x_ref[pl.ds(base + k * cl, cl), cols] for k in range(r)], axis=1))
        xg = groups[0] if tb == 1 else jnp.concatenate(groups, axis=0)
        # Width/phase interleave as a permutation matmul (exactly one 1.0 per
        # output column -> pure selection, bit-exact):
        #   y[m, w*r + k] = xg[m, k*sw + w]
        y = jnp.dot(xg, perm, preferred_element_type=jnp.float32)
        o_ref[:, pl.ds(j * sw * r, sw * r)] = y.astype(o_ref.dtype)


def _make_perm_matrix(upscale: int, sw: int, dtype) -> jax.Array:
    r = upscale
    i = jnp.arange(r * sw)                  # source column index: k*sw + w
    dest = (i % sw) * r + (i // sw)         # destination column:  w*r + k
    return (dest[:, None] == jnp.arange(sw * r)[None, :]).astype(dtype)


def _choose_tiles(B, C, cl, W, itemsize):
    """Pick (tb, tw): width block tw (128-multiple divisor of W, <= 512) and
    batch fold tb (divisor of B) so blocks stay small and M = tb*cl is decent."""
    sw = _SW
    tw = sw
    while (tw * 2) <= W and W % (tw * 2) == 0 and (tw * 2) <= 512:
        tw *= 2
    # batch fold: raise matmul M toward a few hundred rows, ~2 MiB input block cap
    vmem_cap = max(1, (2 * 1024 * 1024) // (C * tw * itemsize))
    tb = 1
    for cand in range(1, B + 1):
        if B % cand == 0 and cand <= vmem_cap and cand * cl <= 512:
            tb = cand
    # keep at least one "parallel" grid axis >= 2 when possible (v7x: 2 TCs)
    if (B // tb) == 1 and (W // tw) == 1 and tb % 2 == 0:
        tb //= 2
    return tb, tw, sw


def pixel_shuffle_1d_ref(x: jax.Array, upscale_factor: int) -> jax.Array:
    """Pure-JAX reference matching the PyTorch module exactly."""
    B, C, W = x.shape
    r = upscale_factor
    cl = C // r
    return jnp.transpose(x.reshape(B, r, cl, W), (0, 2, 3, 1)).reshape(B, cl, W * r)


def pixel_shuffle_1d(x: jax.Array, upscale_factor: int) -> jax.Array:
    B, C, W = x.shape
    r = upscale_factor
    assert C % r == 0, "channel count must be divisible by the upscale factor"
    cl = C // r
    dt = jnp.dtype(x.dtype)
    isz = dt.itemsize
    # sublane packing per dtype (slices at multiples of `packing` are free)
    packing = {jnp.dtype(jnp.float32): 8, jnp.dtype(jnp.bfloat16): 16}.get(dt)

    kernel_ok = (
        packing is not None                         # float only: v7x MXU has no int path
        and cl % packing == 0                       # aligned channel-group slices
        and W % 128 == 0                            # lane-aligned width tiles
        and r * r * _SW * _SW * isz <= 2 * 1024 * 1024   # keep the perm matrix small
    )
    if not kernel_ok:
        # TODO(synk): int / misaligned / huge-r configs use XLA's native relayout
        # (pure data movement; a masked / relayout-heavy Pallas path would be slower).
        return pixel_shuffle_1d_ref(x, r)

    tb, tw, sw = _choose_tiles(B, C, cl, W, isz)
    n_sub = tw // sw
    perm = _make_perm_matrix(r, sw, x.dtype)        # (r*sw, sw*r), 0/1, resident

    x2 = x.reshape(B * C, W)                        # free, contiguous reshape
    cost = pl.CostEstimate(
        flops=2 * (B * cl) * (W * r) * (r * sw),
        transcendentals=0,
        bytes_accessed=2 * B * C * W * isz + perm.size * isz,
    )

    out2 = pl.pallas_call(
        functools.partial(_pixel_shuffle_kernel,
                          r=r, cl=cl, C=C, tb=tb, sw=sw, n_sub=n_sub),
        grid=(B // tb, W // tw),
        in_specs=[
            pl.BlockSpec((tb * C, tw), lambda bi, wi: (bi, wi)),
            pl.BlockSpec((r * sw, sw * r), lambda bi, wi: (0, 0)),   # constant block
        ],
        out_specs=pl.BlockSpec((tb * cl, tw * r), lambda bi, wi: (bi, wi)),
        out_shape=jax.ShapeDtypeStruct((B * cl, W * r), x.dtype),
        compiler_params=pltpu.CompilerParams(
            dimension_semantics=("parallel", "parallel"),
            vmem_limit_bytes=32 * 1024 * 1024),
        cost_estimate=cost,
    )(x2, perm)
    return out2.reshape(B, cl, W * r)               # free, contiguous reshape


if __name__ == "__main__":
    # audiounet-style demo: upscale factor 2, small NCW shapes -> output (4, 16, 512).
    B, C, W, r = 4, 32, 256, 2
    x = jax.random.normal(jax.random.PRNGKey(0), (B, C, W)).astype(jnp.bfloat16)

    y = jax.block_until_ready(pixel_shuffle_1d(x, r))
    y_ref = pixel_shuffle_1d_ref(x, r)

    assert y.shape == (B, C // r, W * r), y.shape
    # bf16 inputs: the 0/1-permutation matmul selects values exactly -> bit-exact.
    assert bool(jnp.array_equal(y, y_ref)), "Pallas pixel shuffle mismatch vs reference"
    print("KERNEL_OK")
</pallas_src>

<mosaic_0001>
module attributes {stable_mosaic.version = 11 : i64} {
  func.func @_pixel_shuffle_kernel(%arg0: i32, %arg1: i32, %arg2: memref<64x256xbf16, #tpu.memory_space<vmem>>, %arg3: memref<256x256xbf16, #tpu.memory_space<vmem>>, %arg4: memref<32x512xbf16, #tpu.memory_space<vmem>>) attributes {dimension_semantics = [#tpu.dimension_semantics<parallel>, #tpu.dimension_semantics<parallel>], iteration_bounds = array<i64: 2, 1>, scalar_prefetch = 0 : i64, scratch_operands = 0 : i64, tpu.core_type = #tpu.core_type<tc>, window_params = [{transform_indices = @transform_0, window_bounds = array<i64: 64, 256>}, {pipeline_mode = #tpu.pipeline_mode<synchronous>, transform_indices = @transform_1, window_bounds = array<i64: 256, 256>}, {transform_indices = @transform_2, window_bounds = array<i64: 32, 512>}]} {
    %c0 = arith.constant 0 : index
    %c0_0 = arith.constant 0 : index
    %0 = vector.load %arg3[%c0, %c0_0] : memref<256x256xbf16, #tpu.memory_space<vmem>>, vector<256x256xbf16>
    %c0_1 = arith.constant 0 : index
    %c0_2 = arith.constant 0 : index
    %1 = vector.load %arg2[%c0_1, %c0_2] : memref<64x256xbf16, #tpu.memory_space<vmem>>, vector<16x128xbf16>
    %c16 = arith.constant 16 : index
    %c0_3 = arith.constant 0 : index
    %2 = vector.load %arg2[%c16, %c0_3] : memref<64x256xbf16, #tpu.memory_space<vmem>>, vector<16x128xbf16>
    %3 = tpu.concatenate %1, %2 in 1 : vector<16x128xbf16>, vector<16x128xbf16> -> vector<16x256xbf16>
    %c32 = arith.constant 32 : index
    %c0_4 = arith.constant 0 : index
    %4 = vector.load %arg2[%c32, %c0_4] : memref<64x256xbf16, #tpu.memory_space<vmem>>, vector<16x128xbf16>
    %c48 = arith.constant 48 : index
    %c0_5 = arith.constant 0 : index
    %5 = vector.load %arg2[%c48, %c0_5] : memref<64x256xbf16, #tpu.memory_space<vmem>>, vector<16x128xbf16>
    %6 = tpu.concatenate %4, %5 in 1 : vector<16x128xbf16>, vector<16x128xbf16> -> vector<16x256xbf16>
    %7 = tpu.concatenate %3, %6 in 0 : vector<16x256xbf16>, vector<16x256xbf16> -> vector<32x256xbf16>
    %cst = arith.constant dense<0.000000e+00> : vector<32x256xf32>
    %8 = tpu.matmul %7, %0, %cst {dimension_numbers = #tpu.dot_dimension_numbers<[1], [0], [0], [1], [0, 0, 1, 1], [], []>} : vector<32x256xbf16>, vector<256x256xbf16>, vector<32x256xf32> -> vector<32x256xf32>
    %9 = arith.truncf %8 : vector<32x256xf32> to vector<32x256xbf16>
    %c0_6 = arith.constant 0 : index
    %c0_7 = arith.constant 0 : index
    %10 = vector.load %arg4[%c0_6, %c0_7] : memref<32x512xbf16, #tpu.memory_space<vmem>>, vector<32x256xbf16>
    tpu.vector_store %arg4[%c0_6, %c0_7], %9 {strides = array<i32>} : memref<32x512xbf16, #tpu.memory_space<vmem>>, vector<32x256xbf16>,
    %c0_8 = arith.constant 0 : index
    %c128 = arith.constant 128 : index
    %11 = vector.load %arg2[%c0_8, %c128] : memref<64x256xbf16, #tpu.memory_space<vmem>>, vector<16x128xbf16>
    %c16_9 = arith.constant 16 : index
    %c128_10 = arith.constant 128 : index
    %12 = vector.load %arg2[%c16_9, %c128_10] : memref<64x256xbf16, #tpu.memory_space<vmem>>, vector<16x128xbf16>
    %13 = tpu.concatenate %11, %12 in 1 : vector<16x128xbf16>, vector<16x128xbf16> -> vector<16x256xbf16>
    %c32_11 = arith.constant 32 : index
    %c128_12 = arith.constant 128 : index
    %14 = vector.load %arg2[%c32_11, %c128_12] : memref<64x256xbf16, #tpu.memory_space<vmem>>, vector<16x128xbf16>
    %c48_13 = arith.constant 48 : index
    %c128_14 = arith.constant 128 : index
    %15 = vector.load %arg2[%c48_13, %c128_14] : memref<64x256xbf16, #tpu.memory_space<vmem>>, vector<16x128xbf16>
    %16 = tpu.concatenate %14, %15 in 1 : vector<16x128xbf16>, vector<16x128xbf16> -> vector<16x256xbf16>
    %17 = tpu.concatenate %13, %16 in 0 : vector<16x256xbf16>, vector<16x256xbf16> -> vector<32x256xbf16>
    %cst_15 = arith.constant dense<0.000000e+00> : vector<32x256xf32>
    %18 = tpu.matmul %17, %0, %cst_15 {dimension_numbers = #tpu.dot_dimension_numbers<[1], [0], [0], [1], [0, 0, 1, 1], [], []>} : vector<32x256xbf16>, vector<256x256xbf16>, vector<32x256xf32> -> vector<32x256xf32>
    %19 = arith.truncf %18 : vector<32x256xf32> to vector<32x256xbf16>
    %c0_16 = arith.constant 0 : index
    %c256 = arith.constant 256 : index
    %20 = vector.load %arg4[%c0_16, %c256] : memref<32x512xbf16, #tpu.memory_space<vmem>>, vector<32x256xbf16>
    tpu.vector_store %arg4[%c0_16, %c256], %19 {strides = array<i32>} : memref<32x512xbf16, #tpu.memory_space<vmem>>, vector<32x256xbf16>,
    return
  }
  func.func @transform_0(%arg0: i32, %arg1: i32) -> (i32, i32) {
    %c0_i32 = arith.constant 0 : i32
    return %arg0, %arg1 : i32, i32
  }
  func.func @transform_1(%arg0: i32, %arg1: i32) -> (i32, i32) {
    %c0_i32 = arith.constant 0 : i32
    %c0_i32_0 = arith.constant 0 : i32
    %c0_i32_1 = arith.constant 0 : i32
    return %c0_i32, %c0_i32_0 : i32, i32
  }
  func.func @transform_2(%arg0: i32, %arg1: i32) -> (i32, i32) {
    %c0_i32 = arith.constant 0 : i32
    return %arg0, %arg1 : i32, i32
  }
}

</mosaic_0001>

<bundles_post_ra>
// kernel: tpu_custom_call.1
= control target key start
LH: loop header
LB: loop body
LE: loop exit
PB: predicated region body
PF: predicated region fallthrough
CT: control target
= control target key end

     0   :  { %7 = vsyncpa [#allocation3], 0  ;;  %s1307_s0 = inlined_call_operand.hbm [shape: bf16[128,256], index: 0, kind: input, shape index: {}]   ;;  %s1308_s1 = inlined_call_operand.hbm [shape: bf16[256,256], index: 1, kind: input, shape index: {}]   ;;  %s1309_s2 = inlined_call_operand.hbm [shape: bf16[64,512], index: 2, kind: output, shape index: {}]  }
   0x1   :  { %9 = vsyncpa [#allocation3 + $0x1], 0 }
   0x2   :  { %10 = vsyncpa [#allocation6], 0 }
   0x3   :  { %11 = vsyncpa [#allocation4], 0 }
   0x4   :  { %13 = vsyncpa [#allocation4 + $0x1], 0  ;;  %s1106_s9 = smov 0   ;;  %s1108_s10 = smov 0  }
   0x5   :  { %s1110_s11 = smov 0   ;;  %s1112_s12 = smov 0  }
   0x6   :  { %s1114_s13 = smov 0   ;;  %s1116_s14 = smov 0  }
   0x7 LB: > { %s732_s15 = sadd.s32 4294967295, %s1082_s14   ;;  %s733_s16 = sadd.s32 4294967294, %s1082_s14   ;;  %s1082_s14 = sphi %s1116_s14, %s19_s14   ;;  %s1078_s13 = sphi %s1114_s13, %s1329_s13   ;;  %s1074_s12 = sphi %s1112_s12, %s1328_s12   ;;  %s1070_s11 = sphi %s1110_s11, %s1327_s11   ;;  %s1066_s10 = sphi %s1108_s10, %s1326_s10   ;;  %s1062_s9 = sphi %s1106_s9, %s1325_s9  }
   0x8   : > { %p53_p0 = scmp.ne.s32.totalorder %s1066_s10, %s1062_s9  ;;  %p1140_p1 = scmp.eq.s32.totalorder %s732_s15, 0 }
   0x9   : > { %p1144_p2 = scmp.eq.s32.totalorder %s732_s15, 1  ;;  %p106_p3 = scmp.eq.s32.totalorder %s733_s16, 1 }
   0xa   : > { %p1150_p4 = por %p1140_p1, %p53_p0  ;;  %p734_p5 = scmp.ge.s32.totalorder %s1082_s14, 1 }
   0xb   : > { %p1155_p6 = por %p106_p3, %p53_p0  ;;  %p113_p7 = scmp.lt.s32.totalorder %s1082_s14, 3 }
   0xc   : > { %s1314_s19 = scalar_select %p1150_p4, 1, 0 }
   0xd   : > { %s1315_s20 = scalar_select %p1155_p6, 1, 0 }
   0xe   : > { %p1160_p8 = pnand %p734_p5, %p113_p7  ;;  %s1084_s22 = smov [#allocation5]  }
   0xf   : > { %s125_s23 = sshll.u32 %s1084_s22, 4  ;;  %s31_s25 = sadd.s32 1, %s1078_s13  ;;  %s126_s23 = int_to_ptr.vmem [resolvable:$true] %s125_s23 }
  0x10   : > { %p819_p9 = pneg %p1160_p8  ;;  %s955_s26 = scalar_lea.vmem %s126_s23, 4096 }
  0x11   : > { %p956_p13 = scmp.ne.s32.totalorder %s126_s23, %s955_s26  ;;  %p963_p5 = scmp.lt.s32.totalorder %s126_s23, %s126_s23 }
  0x12   : > { %p1169_p11 = pnand %p819_p9, %p1140_p1  ;;  %p964_p7 = scmp.lt.s32.totalorder %s955_s26, %s955_s26 }
  0x14   : > { %p946_p12 = pneg %p1169_p11  ;;  %p965_p6 = por %p964_p7, %p963_p5 }
  0x16   : > { %p958_p0 = pnand %p956_p13, %p946_p12 }
  0x18   : > { %p959_p3 = pneg %p958_p0 }
  0x1a   : > { %p966_p4 = pnand %p965_p6, %p959_p3 }
  0x1c   : > { %969 = shalt.err (!%p966_p4)
}
  0x1d   : > { %s1311_s27 = smov 128   ;;  %s1086_s28 = smov 8  }
  0x1e   : > { %822 = dma.hbm_to_vmem [thread:$0]  (!%p1169_p11), %s1308_s1, 4096, %s126_s23, [#allocation6], %s1311_s27, %s1311_s27, %s1086_s28  }
  0x1f   : > { %p33_p4 = scmp.ge.s32.totalorder %s31_s25, 2  ;;  %s40_s3 = sadd.s32 1, %s1070_s11 }
  0x20   : > { %p47_p6 = scmp.ne.s32.totalorder %s1070_s11, %s1066_s10  ;;  %p48_p9 = scmp.eq.s32.totalorder %s1082_s14, 0 }
  0x21   : > { %s1331_s25 = smov (%p33_p4, %s31_s25), 0  ;;  %p832_p0 = scmp.lt.s32.totalorder %s1082_s14, 2 }
  0x22   : > { %p1190_p12 = por %p48_p9, %p47_p6  ;;  %p1196_p13 = por %p1144_p2, %p47_p6 }
  0x23   : > { %s35_s6 = ssub.s32 %s1078_s13, %s1331_s25  ;;  %s139_s7 = sand.u32 1, %s1070_s11  }
  0x24   : > { %p38_p11 = scmp.eq.s32.totalorder %s35_s6, 0  ;;  %s737_s8 = sshll.u32 %s139_s7, 6 }
  0x25   : > { %s800_s16 = sshll.u32 %s1078_s13, 10  ;;  %s143_s26 = scalar_lea.vmem [#allocation2], %s737_s8 }
  0x26   : > { %s1205_s15 = scalar_select %p38_p11, %s1070_s11, %s40_s3  }
  0x27   : > { %s152_s24 = scalar_lea.hbm %s1307_s0, %s800_s16  ;;  %s153_s29 = sshll.u32 %s143_s26, 4  ;;  %s154_s29 = int_to_ptr.vmem [resolvable:$true] %s153_s29 }
  0x28   : > { %p1213_p2 = pnand %p832_p0, %p1190_p12  ;;  %s140_s30 = scalar_lea.sflag [#allocation3], %s139_s7 }
  0x29   : > { %s983_s6 = scalar_lea.vmem %s154_s29, 1024  ;;  %s1087_s3 = smov [#allocation2]  }
  0x2a   : > { %p972_p3 = pneg %p1213_p2  ;;  %p984_p5 = scmp.ne.s32.totalorder %s154_s29, %s983_s6 }
  0x2b   : > { %s988_s27 = sshll.u32 %s1087_s3, 4  ;;  %s989_s27 = int_to_ptr.vmem [resolvable:$false] %s988_s27 }
  0x2c   : > { %p986_p7 = pnand %p984_p5, %p972_p3  ;;  %s990_s16 = scalar_lea.vmem %s989_s27, 2048 }
  0x2d   : > { %p991_p6 = scmp.lt.s32.totalorder %s154_s29, %s989_s27  ;;  %p992_p9 = scmp.lt.s32.totalorder %s990_s16, %s983_s6 }
  0x2e   : > { %p987_p4 = pneg %p986_p7 }
  0x2f   : > { %p993_p11 = por %p992_p9, %p991_p6 }
  0x31   : > { %p994_p10 = pnand %p993_p11, %p987_p4 }
  0x33   : > { %997 = shalt.err (!%p994_p10)
}
  0x34   : > { %s1321_s4 = smov 128   ;;  %165 = sbr.rel (%p1160_p8) target bundleno = 348 (0x15c), region = 28 }
  0x35   : > { %826 = dma.hbm_to_vmem [thread:$0]  (!%p1213_p2), %s152_s24, 1024, %s154_s29, %s140_s30, %s1321_s4, %s1321_s4, %s1086_s28  }
  0x36   : > { %s1227_s7 = sand.u32 (!%p1160_p8), 1, %s1066_s10   ;;  %p1322_p10 = scmp.ne.s32.totalorder (!%p1160_p8), %s1314_s19, 0 }
  0x37   : > { %s742_s27 = sshll.u32 (!%p1160_p8), %s1227_s7, 6  ;;  %s168_s8 = scalar_lea.sflag (!%p1160_p8), [#allocation3], %s1227_s7 }
  0x38   : > { %s1233_s22 = scalar_lea.vmem (!%p1160_p8), [#allocation2], %s742_s27 }
  0x39   : > { %1049 = dma.done.wait (%p1322_p10), %s168_s8, 1024  }
  0x3a   : > { %1051 = vsyncadd (%p1322_p10), %s168_s8, 4294966272 }
  0x3b   : > { %1053 = dma.done.wait (%p1140_p1), [#allocation6], 4096  }
  0x3c   : > { %1055 = vsyncadd (%p1140_p1), [#allocation6], 4294963200  ;;  %v888_v0 = vld [vmem:[#allocation5 + $0x74] ss:$8 sps:$4 sm:$0xff]   ;;  %v890_v1 = vld [vmem:[#allocation5 + $0x70] ss:$8 sps:$4 sm:$0xff]  }
  0x3d   : > { %424 = vmatprep.subr.bf16.mxu0 %v888_v0  ;;  %537 = vmatprep.subr.bf16.mxu1 %v888_v0  ;;  %v891_v2 = vld [vmem:[#allocation5 + $0x64] ss:$8 sps:$4 sm:$0xff]   ;;  %v893_v3 = vld [vmem:[#allocation5 + $0x60] ss:$8 sps:$4 sm:$0xff]   ;;  %v894_v4 = vld [vmem:[#allocation5 + $0x54] ss:$8 sps:$4 sm:$0xff]  }
  0x3e   : > { %425 = vmatpush1.bf16.msra.mxu0 %v890_v1  ;;  %538 = vmatpush1.bf16.msra.mxu1 %v890_v1  ;;  %v896_v5 = vld [vmem:[#allocation5 + $0x50] ss:$8 sps:$4 sm:$0xff]   ;;  %v897_v6 = vld [vmem:[#allocation5 + $0x44] ss:$8 sps:$4 sm:$0xff]   ;;  %v899_v7 = vld [vmem:[#allocation5 + $0x40] ss:$8 sps:$4 sm:$0xff]  }
  0x3f   : > { %426 = vmatprep.subr.bf16.mxu0 %v891_v2  ;;  %539 = vmatprep.subr.bf16.mxu1 %v891_v2  ;;  %v900_v8 = vld [vmem:[#allocation5 + $0x34] ss:$8 sps:$4 sm:$0xff]   ;;  %v902_v9 = vld [vmem:[#allocation5 + $0x30] ss:$8 sps:$4 sm:$0xff]   ;;  %v903_v10 = vld [vmem:[#allocation5 + $0x24] ss:$8 sps:$4 sm:$0xff]  }
  0x40   : > { %v905_v11 = vld [vmem:[#allocation5 + $0x20] ss:$8 sps:$4 sm:$0xff]   ;;  %v906_v12 = vld [vmem:[#allocation5 + $0x14] ss:$8 sps:$4 sm:$0xff]   ;;  %v908_v13 = vld [vmem:[#allocation5 + $0x10] ss:$8 sps:$4 sm:$0xff]  }
  0x41   : > { %v936_v14 = vld [vmem:[%s1233_s22 + $0x10] ss:$8 sps:$4 sm:$0xff]   ;;  %v937_v15 = vld [vmem:[%s1233_s22 + $0x14] ss:$8 sps:$4 sm:$0xff]   ;;  %v909_v16 = vld [vmem:[#allocation5 + $0x4] ss:$8 sps:$4 sm:$0xff]  }
  0x42   : > { %427 = vmatpush1.bf16.msra.mxu0 %v893_v3  ;;  %540 = vmatpush1.bf16.msra.mxu1 %v893_v3  ;;  %v911_v17 = vld [vmem:[#allocation5] ss:$8 sps:$4 sm:$0xff]   ;;  %v912_v18 = vld [vmem:[#allocation5 + $0xf4] ss:$8 sps:$4 sm:$0xff]   ;;  %v914_v19 = vld [vmem:[#allocation5 + $0xf0] ss:$8 sps:$4 sm:$0xff]  }
  0x43   : > { %428 = vmatprep.subr.bf16.mxu0 %v894_v4  ;;  %541 = vmatprep.subr.bf16.mxu1 %v894_v4  ;;  %v915_v20 = vld [vmem:[#allocation5 + $0xe4] ss:$8 sps:$4 sm:$0xff]   ;;  %v917_v21 = vld [vmem:[#allocation5 + $0xe0] ss:$8 sps:$4 sm:$0xff]   ;;  %v918_v22 = vld [vmem:[#allocation5 + $0xd4] ss:$8 sps:$4 sm:$0xff]  }
  0x44   : > { %456 = vmatprep.mubr.bf16.mxu0 %v936_v14  ;;  %569 = vmatprep.mubr.bf16.mxu1 %v937_v15  ;;  %v920_v23 = vld [vmem:[#allocation5 + $0xd0] ss:$8 sps:$4 sm:$0xff]   ;;  %v921_v24 = vld [vmem:[#allocation5 + $0xc4] ss:$8 sps:$4 sm:$0xff]   ;;  %v923_v25 = vld [vmem:[#allocation5 + $0xc0] ss:$8 sps:$4 sm:$0xff]  }
  0x45   : > { %v924_v26 = vld [vmem:[#allocation5 + $0xb4] ss:$8 sps:$4 sm:$0xff]   ;;  %v926_v27 = vld [vmem:[#allocation5 + $0xb0] ss:$8 sps:$4 sm:$0xff]   ;;  %v927_v28 = vld [vmem:[#allocation5 + $0xa4] ss:$8 sps:$4 sm:$0xff]  }
  0x46   : > { %429 = vmatpush1.bf16.msra.mxu0 %v896_v5  ;;  %542 = vmatpush1.bf16.msra.mxu1 %v896_v5  ;;  %v929_v29 = vld [vmem:[#allocation5 + $0xa0] ss:$8 sps:$4 sm:$0xff]   ;;  %v930_v30 = vld [vmem:[#allocation5 + $0x94] ss:$8 sps:$4 sm:$0xff]   ;;  %v932_v31 = vld [vmem:[#allocation5 + $0x90] ss:$8 sps:$4 sm:$0xff]  }
  0x47   : > { %430 = vmatprep.subr.bf16.mxu0 %v897_v6  ;;  %543 = vmatprep.subr.bf16.mxu1 %v897_v6  ;;  %v933_v32 = vld [vmem:[#allocation5 + $0x84] ss:$8 sps:$4 sm:$0xff]   ;;  %v935_v33 = vld [vmem:[#allocation5 + $0x80] ss:$8 sps:$4 sm:$0xff]   ;;  %v940_v36 = vld [vmem:[%s1233_s22 + $0x30] ss:$8 sps:$4 sm:$0xff]  }
  0x48   : > { %v938_v34 = vld [vmem:[%s1233_s22] ss:$8 sps:$4 sm:$0xff]   ;;  %v939_v35 = vld [vmem:[%s1233_s22 + $0x4] ss:$8 sps:$4 sm:$0xff]   ;;  %v941_v37 = vld [vmem:[%s1233_s22 + $0x34] ss:$8 sps:$4 sm:$0xff]  }
  0x49   : > { %v942_v38 = vld [vmem:[%s1233_s22 + $0x20] ss:$8 sps:$4 sm:$0xff]   ;;  %v943_v39 = vld [vmem:[%s1233_s22 + $0x24] ss:$8 sps:$4 sm:$0xff]   ;;  %s195_s17 = scalar_lea.vmem [#allocation7], %s742_s27  ;;  %s810_s21 = sshll.u32 %s1074_s12, 10 }
  0x4a   : > { %431 = vmatpush1.bf16.msra.mxu0 %v899_v7  ;;  %544 = vmatpush1.bf16.msra.mxu1 %v899_v7  ;;  %s635_s19 = sshll.u32 %s195_s17, 4  ;;  %s1259_s24 = scalar_lea.hbm %s1309_s2, %s810_s21  ;;  %s1254_s19 = int_to_ptr.vmem [resolvable:$true] %s635_s19 }
  0x4b   : > { %432 = vmatprep.subr.bf16.mxu0 %v900_v8  ;;  %545 = vmatprep.subr.bf16.mxu1 %v900_v8  ;;  %s619_s12 = scalar_lea.sflag [#allocation4], %s1227_s7  ;;  %s998_s26 = scalar_lea.vmem %s1254_s19, 1024 }
  0x4c   : > { %p999_p1 = scmp.ne.s32.totalorder %s1254_s19, %s998_s26  ;;  %s1088_s29 = smov [#allocation7]  }
  0x4d   : > { %s1002_s18 = sshll.u32 %s1088_s29, 4  ;;  %s1003_s18 = int_to_ptr.vmem [resolvable:$false] %s1002_s18 }
  0x4e   : > { %433 = vmatpush1.bf16.msra.mxu0 %v902_v9  ;;  %546 = vmatpush1.bf16.msra.mxu1 %v902_v9  ;;  %p1000_p8 = pnand %p999_p1, %p1196_p13  ;;  %s1004_s30 = scalar_lea.vmem %s1003_s18, 2048 }
  0x4f   : > { %434 = vmatprep.subr.bf16.mxu0 %v903_v10  ;;  %547 = vmatprep.subr.bf16.mxu1 %v903_v10  ;;  %p1005_p0 = scmp.lt.s32.totalorder %s1254_s19, %s1003_s18  ;;  %p1006_p2 = scmp.lt.s32.totalorder %s1004_s30, %s998_s26 }
  0x50   : > { %p1001_p12 = pneg %p1000_p8 }
  0x51   : > { %p1007_p3 = por %p1006_p2, %p1005_p0 }
  0x52   : > { %435 = vmatpush1.bf16.msra.mxu0 %v905_v11  ;;  %548 = vmatpush1.bf16.msra.mxu1 %v905_v11 }
  0x53   : > { %436 = vmatprep.subr.bf16.mxu0 %v906_v12  ;;  %549 = vmatprep.subr.bf16.mxu1 %v906_v12  ;;  %p1008_p5 = pnand %p1007_p3, %p1001_p12 }
  0x56   : > { %437 = vmatpush1.bf16.msra.mxu0 %v908_v13  ;;  %550 = vmatpush1.bf16.msra.mxu1 %v908_v13 }
  0x57   : > { %438 = vmatprep.subr.bf16.mxu0 %v909_v16  ;;  %551 = vmatprep.subr.bf16.mxu1 %v909_v16 }
  0x5a   : > { %439 = vmatpush1.bf16.msra.mxu0 %v911_v17  ;;  %552 = vmatpush1.bf16.msra.mxu1 %v911_v17 }
  0x5b   : > { %440 = vmatprep.subr.bf16.mxu0 %v912_v18  ;;  %553 = vmatprep.subr.bf16.mxu1 %v912_v18 }
  0x5e   : > { %441 = vmatpush2.bf16.msra.mxu0 %v914_v19  ;;  %554 = vmatpush2.bf16.msra.mxu1 %v914_v19 }
  0x5f   : > { %442 = vmatprep.subr.bf16.mxu0 %v915_v20  ;;  %555 = vmatprep.subr.bf16.mxu1 %v915_v20 }
  0x62   : > { %443 = vmatpush2.bf16.msra.mxu0 %v917_v21  ;;  %556 = vmatpush2.bf16.msra.mxu1 %v917_v21 }
  0x63   : > { %444 = vmatprep.subr.bf16.mxu0 %v918_v22  ;;  %557 = vmatprep.subr.bf16.mxu1 %v918_v22 }
  0x66   : > { %445 = vmatpush2.bf16.msra.mxu0 %v920_v23  ;;  %558 = vmatpush2.bf16.msra.mxu1 %v920_v23 }
  0x67   : > { %446 = vmatprep.subr.bf16.mxu0 %v921_v24  ;;  %559 = vmatprep.subr.bf16.mxu1 %v921_v24 }
  0x6a   : > { %447 = vmatpush2.bf16.msra.mxu0 %v923_v25  ;;  %560 = vmatpush2.bf16.msra.mxu1 %v923_v25 }
  0x6b   : > { %448 = vmatprep.subr.bf16.mxu0 %v924_v26  ;;  %561 = vmatprep.subr.bf16.mxu1 %v924_v26 }
  0x6e   : > { %449 = vmatpush2.bf16.msra.mxu0 %v926_v27  ;;  %562 = vmatpush2.bf16.msra.mxu1 %v926_v27 }
  0x6f   : > { %450 = vmatprep.subr.bf16.mxu0 %v927_v28  ;;  %563 = vmatprep.subr.bf16.mxu1 %v927_v28 }
  0x72   : > { %451 = vmatpush2.bf16.msra.mxu0 %v929_v29  ;;  %564 = vmatpush2.bf16.msra.mxu1 %v929_v29 }
  0x73   : > { %452 = vmatprep.subr.bf16.mxu0 %v930_v30  ;;  %565 = vmatprep.subr.bf16.mxu1 %v930_v30 }
  0x76   : > { %453 = vmatpush2.bf16.msra.mxu0 %v932_v31  ;;  %566 = vmatpush2.bf16.msra.mxu1 %v932_v31 }
  0x77   : > { %454 = vmatprep.subr.bf16.mxu0 %v933_v32  ;;  %567 = vmatprep.subr.bf16.mxu1 %v933_v32 }
  0x7a   : > { %455 = vmatpush2.bf16.msra.mxu0 %v935_v33  ;;  %568 = vmatpush2.bf16.msra.mxu1 %v935_v33 }
  0x7d   : > { %457 = vmatmul.mubr.bf16.vlgmr.msra.gmra.mxu0 %v938_v34  ;;  %570 = vmatmul.mubr.bf16.vlgmr.msra.gmra.mxu1 %v939_v35 }
  0x7e   : > { %466 = vmatprep.mubr.bf16.mxu0 %v940_v36  ;;  %579 = vmatprep.mubr.bf16.mxu1 %v941_v37 }
  0x85   : > { %467 = vmatmul.mubr.bf16.gmra.mxu0 %v942_v38  ;;  %580 = vmatmul.mubr.bf16.gmra.mxu1 %v943_v39 }
 0x13d   : > { %v458_v40 = vpop.f32.mrf.mxu0  ;;  %v571_v41 = vpop.f32.mrf.mxu1 }
 0x13f   : > { %v460_v42 = vpop.f32.mrf.mxu0  ;;  %v573_v43 = vpop.f32.mrf.mxu1 }
 0x140   : > { %v801_v44 = vpack.c.bf16 %v460_v42, %v458_v40  ;;  %v805_v45 = vpack.c.bf16 %v573_v43, %v571_v41 }
 0x141   : > { %v462_v46 = vpop.f32.mrf.mxu0  ;;  %v575_v47 = vpop.f32.mrf.mxu1 }
 0x142   : > { %501 = vst [vmem:[%s195_s17] sm:$0xff] %v801_v44  ;;  %614 = vst [vmem:[%s195_s17 + $0x8] sm:$0xff] %v805_v45 }
 0x143   : > { %v464_v48 = vpop.f32.mrf.mxu0  ;;  %v577_v49 = vpop.f32.mrf.mxu1 }
 0x144   : > { %v802_v50 = vpack.c.bf16 %v464_v48, %v462_v46  ;;  %v806_v51 = vpack.c.bf16 %v577_v49, %v575_v47 }
 0x145   : > { %v468_v52 = vpop.f32.mrf.mxu0  ;;  %v581_v53 = vpop.f32.mrf.mxu1 }
 0x146   : > { %502 = vst [vmem:[%s195_s17 + $0x10] sm:$0xff] %v802_v50  ;;  %615 = vst [vmem:[%s195_s17 + $0x18] sm:$0xff] %v806_v51 }
 0x147   : > { %v470_v54 = vpop.f32.mrf.mxu0  ;;  %v583_v55 = vpop.f32.mrf.mxu1 }
 0x148   : > { %v803_v56 = vpack.c.bf16 %v470_v54, %v468_v52  ;;  %v807_v57 = vpack.c.bf16 %v583_v55, %v581_v53 }
 0x149   : > { %v472_v58 = vpop.f32.mrf.mxu0  ;;  %v585_v59 = vpop.f32.mrf.mxu1 }
 0x14a   : > { %503 = vst [vmem:[%s195_s17 + $0x20] sm:$0xff] %v803_v56  ;;  %616 = vst [vmem:[%s195_s17 + $0x28] sm:$0xff] %v807_v57 }
 0x14b   : > { %v474_v60 = vpop.f32.mrf.mxu0  ;;  %v587_v61 = vpop.f32.mrf.mxu1 }
 0x14c   : > { %v804_v62 = vpack.c.bf16 %v474_v60, %v472_v58  ;;  %v808_v63 = vpack.c.bf16 %v587_v61, %v585_v59 }
 0x14e   : > { %504 = vst [vmem:[%s195_s17 + $0x30] sm:$0xff] %v804_v62  ;;  %617 = vst [vmem:[%s195_s17 + $0x38] sm:$0xff] %v808_v63 }
 0x14f   : > { %1011 = shalt.err (!%p1008_p5)
}
 0x150   : > { %s1012_s6 = scalar_lea.hbm %s1259_s24, 1024  ;;  %s1016_s4 = scalar_lea.hbm %s1309_s2, 2048 }
 0x151   : > { %p1013_p7 = scmp.ne.s32.totalorder %s1259_s24, %s1012_s6  ;;  %p1017_p9 = scmp.lt.s32.totalorder %s1259_s24, %s1309_s2 }
 0x152   : > { %p1018_p11 = scmp.lt.s32.totalorder %s1016_s4, %s1012_s6 }
 0x153   : > { %p1014_p4 = pnand %p1013_p7, %p1196_p13 }
 0x154   : > { %p1019_p10 = por %p1018_p11, %p1017_p9 }
 0x155   : > { %p1015_p6 = pneg %p1014_p4 }
 0x157   : > { %p1020_p1 = pnand %p1019_p10, %p1015_p6 }
 0x159   : > { %1023 = shalt.err (!%p1020_p1)
}
 0x15a   : > { %s1089_s22 = smov 256   ;;  %s1090_s17 = smov 16  }
 0x15b   : > { %817 = dma.vmem_to_hbm [thread:$0]  (%p1196_p13), %s1254_s19, 1024, %s1259_s24, %s619_s12, %s1089_s22, %s1089_s22, %s1090_s17  }
 0x15c PF: > { %s650_s21 = sand.u32 1, %s1062_s9   ;;  %p1323_p8 = scmp.ne.s32.totalorder %s1315_s20, 0 }
 0x15d   : > { %p1324_p12 = scmp.ge.s32.totalorder %s1082_s14, 2  ;;  %s651_s28 = scalar_lea.sflag [#allocation4], %s650_s21 }
 0x15f   : > { %p828_p0 = pnand %p1324_p12, %p1323_p8 }
 0x161   : > { %p829_p2 = pneg %p828_p0 }
 0x163   : > { %1057 = dma.done.wait (%p829_p2), %s651_s28, 1024  }
 0x164   : > { %1059 = vsyncadd (%p829_p2), %s651_s28, 4294966272  ;;  %s19_s14 = sadd.s32 1, %s1082_s14   ;;  %s1325_s9 = smov %s1066_s10 }
 0x165   : > { %p16_p3 = scmp.ge.s32.totalorder %s19_s14, 4   ;;  %s1326_s10 = smov %s1070_s11 }
 0x166   : > { %s1327_s11 = smov %s1205_s15  ;;  %s1328_s12 = smov %s1078_s13 }
 0x167   : > { %s1329_s13 = smov %s1331_s25  ;;  %18 = sbr.rel (!%p16_p3) target bundleno = 7 (0x7), region = 77 }
 0x16c   :  { %656 = vsyncpa [#allocation3], 1 }
 0x16d   :  { %658 = vsyncpa [#allocation3 + $0x1], 1 }
 0x16e   :  { %659 = vsyncpa [#allocation6], 1 }
 0x16f   :  { %660 = vsyncpa [#allocation4], 1 }
 0x170   :  { %662 = vsyncpa [#allocation4 + $0x1], 1 }

</bundles_post_ra>
